<compile_context>
chip_gen: v6e
topology: v6e:2x2x1
jax: 0.10.0
libtpu: 0.0.40
codegen_flags: <defaults>
</compile_context>

<pallas_src>
import jax
import jax.numpy as jnp
from jax.experimental import pallas as pl
from jax.experimental.pallas import tpu as pltpu


def _round_up(x, m):
    return (x + m - 1) // m * m


def _dict_layer_kernel(x_ref, wt_ref, b_ref, tgt_ref, grp_ref, y_ref, rssq_ref):
    # x_ref:   (tm, tk) bf16        wt_ref:  (tk, tn) bf16  (W pre-transposed to (F, O))
    # b_ref:   (1, tn)  f32         tgt_ref: (tm, 1)  int32  grp_ref: (1, tn) int32
    # y_ref:   (tm, tn) f32  -- doubles as the K accumulator (index_map constant across k)
    # rssq_ref:(tm, 128) f32 -- per-(i,j) partial row-sums of masked y^2, lane-broadcast (lane-dense store)
    k = pl.program_id(2)

    @pl.when(k == 0)
    def _():
        y_ref[...] = jnp.zeros_like(y_ref)

    # MXU matmul: standard (tm,tk)x(tk,tn) contraction; no in-kernel weight transpose.
    y_ref[...] += jnp.dot(x_ref[...], wt_ref[...],
                          preferred_element_type=jnp.float32)

    @pl.when(k == pl.num_programs(2) - 1)
    def _():
        y = y_ref[...] + b_ref[...]              # bias added once, after full K reduction
        y_ref[...] = y
        # Columns whose class group matches the row's target are excluded from the loss.
        hit = grp_ref[...] == tgt_ref[...]       # (1,tn) vs (tm,1) -> (tm,tn); single vsel
        masked = jnp.where(hit, 0.0, y)
        rowsum = jnp.sum(masked * masked, axis=1, keepdims=True)       # (tm, 1), XLU (has slack)
        rssq_ref[...] = jnp.broadcast_to(rowsum, rssq_ref.shape)       # lane-dense (tm,128) store


def dict_layer_forward(inputs, targets, weights, bias, n_cls, alpha=0.05,
                       tm=1024, tn=1024, tk=512):
    """Returns (y, dict_loss) mirroring DictLayer.forward / getLoss.

    inputs : (N, *) float32   -> flattened to (N, input_features)
    targets: (N,)   int32     class labels in [0, n_cls)
    weights: (output_features, input_features) float32
    bias   : (output_features,) float32
    """
    n = inputs.shape[0]
    x = inputs.reshape(n, -1)
    out_f, in_f = weights.shape
    assert x.shape[1] == in_f
    each_group = out_f // n_cls

    # Tile sizes: lane-dense (128-multiples) on O and F, 16-multiples on the batch dim (bf16 sublanes).
    tm = min(tm, _round_up(n, 16))
    tn = min(tn, _round_up(out_f, 128))
    tk = min(tk, _round_up(in_f, 128))
    n_pad = _round_up(n, tm)
    o_pad = _round_up(out_f, tn)
    f_pad = _round_up(in_f, tk)

    # bf16 operands for the MXU; accumulation stays f32 inside the kernel.
    xb = jnp.pad(x.astype(jnp.bfloat16), ((0, n_pad - n), (0, f_pad - in_f)))
    # Pre-transpose W once in the wrapper (one-time weight prep) -> kernel contracts (1,)x(0,).
    wtb = jnp.pad(weights.T.astype(jnp.bfloat16),
                  ((0, f_pad - in_f), (0, o_pad - out_f)))
    b2 = jnp.pad(bias.astype(jnp.float32), (0, o_pad - out_f)).reshape(1, o_pad)
    tgt = jnp.pad(targets.astype(jnp.int32), (0, n_pad - n)).reshape(n_pad, 1)
    # Precomputed per-column class-group ids (global column index -> no in-kernel int div).
    # Padded columns get group id n_cls (never matches a target); W/bias are zero-padded so they
    # contribute 0 to the loss regardless.
    grp = jnp.pad(jnp.arange(out_f, dtype=jnp.int32) // each_group,
                  (0, o_pad - out_f), constant_values=n_cls).reshape(1, o_pad)

    gi, gj, gk = n_pad // tm, o_pad // tn, f_pad // tk

    cost = pl.CostEstimate(
        flops=2 * n_pad * o_pad * f_pad,
        transcendentals=0,
        bytes_accessed=(gj * n_pad * f_pad * 2        # x re-read for every j tile
                        + gi * o_pad * f_pad * 2      # W^T re-read for every i tile
                        + n_pad * o_pad * 4           # y writeback
                        + n_pad * gj * 128 * 4        # rssq partials
                        + gi * o_pad * 8              # bias + grp streams per i
                        + gj * n_pad * 4))            # targets stream per j

    y_pad, rssq = pl.pallas_call(
        _dict_layer_kernel,
        out_shape=(
            jax.ShapeDtypeStruct((n_pad, o_pad), jnp.float32),
            jax.ShapeDtypeStruct((n_pad, gj * 128), jnp.float32),
        ),
        grid_spec=pltpu.PrefetchScalarGridSpec(
            num_scalar_prefetch=0,
            grid=(gi, gj, gk),
            in_specs=[
                pl.BlockSpec((tm, tk), lambda i, j, k: (i, k)),   # x    (N, F)
                pl.BlockSpec((tk, tn), lambda i, j, k: (k, j)),   # W^T  (F, O) -- pre-transposed
                pl.BlockSpec((1, tn), lambda i, j, k: (0, j)),    # bias (1, O)
                pl.BlockSpec((tm, 1), lambda i, j, k: (i, 0)),    # targets (N, 1)
                pl.BlockSpec((1, tn), lambda i, j, k: (0, j)),    # col->group ids (1, O)
            ],
            out_specs=(
                pl.BlockSpec((tm, tn), lambda i, j, k: (i, j)),   # y (accumulated across k)
                pl.BlockSpec((tm, 128), lambda i, j, k: (i, j)),  # per-(i,j) masked-ssq partial
            ),
        ),
        compiler_params=pltpu.CompilerParams(
            # Per-(i,j) rssq partials make the O axis race-free -> both i and j parallel
            # (megacore-friendly on v7x even when the batch grid is 1).
            dimension_semantics=("parallel", "parallel", "arbitrary"),
            vmem_limit_bytes=32 * 1024 * 1024),
        cost_estimate=cost,
    )(xb, wtb, b2, tgt, grp)

    y = y_pad[:n, :out_f]
    # Lane 0 of each 128-wide j-block holds that block's per-row partial sum; padded rows are
    # excluded simply by slicing.
    dict_loss = alpha * jnp.sqrt(jnp.sum(rssq[:n, 0::128])) / n
    return y, dict_loss


def _reference(inputs, targets, weights, bias, n_cls, alpha):
    """Pure-JAX reference with the same bf16 operand rounding as the kernel."""
    n = inputs.shape[0]
    x = inputs.reshape(n, -1).astype(jnp.bfloat16).astype(jnp.float32)
    w = weights.astype(jnp.bfloat16).astype(jnp.float32)
    y = x @ w.T + bias[None, :].astype(jnp.float32)
    each_group = weights.shape[0] // n_cls
    h = jax.nn.one_hot(targets, n_cls, dtype=jnp.float32)
    h_mat = jnp.repeat(h, each_group, axis=1)
    loss = alpha * jnp.linalg.norm(y * (1.0 - h_mat)) / n
    return y, loss


if __name__ == "__main__":
    ALPHA = 0.05

    # --- small demo consistent with DictLayer(input_features, output_features, nCls) ---
    N, IN_F, OUT_F, N_CLS = 16, 64, 24, 6          # eachGroup = 4
    k_x, k_t, k_w, k_b = jax.random.split(jax.random.PRNGKey(0), 4)
    inputs = jax.random.normal(k_x, (N, IN_F), dtype=jnp.float32)
    targets = jax.random.randint(k_t, (N,), 0, N_CLS, dtype=jnp.int32)
    weights = jax.random.uniform(k_w, (OUT_F, IN_F), minval=-0.1, maxval=0.1,
                                 dtype=jnp.float32)
    bias = jax.random.uniform(k_b, (OUT_F,), minval=-0.1, maxval=0.1,
                              dtype=jnp.float32)

    y, loss = dict_layer_forward(inputs, targets, weights, bias,
                                 n_cls=N_CLS, alpha=ALPHA)
    jax.block_until_ready((y, loss))
    y_ref, loss_ref = _reference(inputs, targets, weights, bias, N_CLS, ALPHA)
    assert jnp.allclose(y, y_ref, atol=1e-3, rtol=1e-3), "y mismatch (small case)"
    assert jnp.allclose(loss, loss_ref, atol=1e-4, rtol=1e-3), "loss mismatch (small case)"

    # --- second case forcing a (3, 3, 3) grid to exercise tiling / K-accumulation / per-j loss partials.
    #     (Deliberately tiny tiles: correctness-only config, NOT a tuned configuration.) ---
    N2, IN2, OUT2, NCLS2 = 48, 384, 320, 5          # eachGroup = 64
    k_x, k_t, k_w, k_b = jax.random.split(jax.random.PRNGKey(1), 4)
    inputs2 = jax.random.normal(k_x, (N2, IN2), dtype=jnp.float32)
    targets2 = jax.random.randint(k_t, (N2,), 0, NCLS2, dtype=jnp.int32)
    weights2 = jax.random.uniform(k_w, (OUT2, IN2), minval=-0.1, maxval=0.1,
                                  dtype=jnp.float32)
    bias2 = jax.random.uniform(k_b, (OUT2,), minval=-0.1, maxval=0.1,
                               dtype=jnp.float32)

    y2, loss2 = dict_layer_forward(inputs2, targets2, weights2, bias2,
                                   n_cls=NCLS2, alpha=ALPHA, tm=16, tn=128, tk=128)
    jax.block_until_ready((y2, loss2))
    y2_ref, loss2_ref = _reference(inputs2, targets2, weights2, bias2, NCLS2, ALPHA)
    assert jnp.allclose(y2, y2_ref, atol=2e-3, rtol=2e-3), "y mismatch (tiled case)"
    assert jnp.allclose(loss2, loss2_ref, atol=1e-3, rtol=2e-3), "loss mismatch (tiled case)"

    print("KERNEL_OK")
</pallas_src>

<mosaic_0001>
module attributes {stable_mosaic.version = 11 : i64} {
  func.func @_dict_layer_kernel(%arg0: i32, %arg1: i32, %arg2: i32, %arg3: memref<16x128xbf16, #tpu.memory_space<vmem>>, %arg4: memref<128x128xbf16, #tpu.memory_space<vmem>>, %arg5: memref<1x128xf32, #tpu.memory_space<vmem>>, %arg6: memref<16x1xi32, #tpu.memory_space<vmem>>, %arg7: memref<1x128xi32, #tpu.memory_space<vmem>>, %arg8: memref<16x128xf32, #tpu.memory_space<vmem>>, %arg9: memref<16x128xf32, #tpu.memory_space<vmem>>) attributes {dimension_semantics = [#tpu.dimension_semantics<parallel>, #tpu.dimension_semantics<parallel>, #tpu.dimension_semantics<arbitrary>], iteration_bounds = array<i64: 1, 1, 1>, scalar_prefetch = 0 : i64, scratch_operands = 0 : i64, tpu.core_type = #tpu.core_type<tc>, window_params = [{transform_indices = @transform_0, window_bounds = array<i64: 16, 128>}, {transform_indices = @transform_1, window_bounds = array<i64: 128, 128>}, {transform_indices = @transform_2, window_bounds = array<i64: 1, 128>}, {transform_indices = @transform_3, window_bounds = array<i64: 16, 1>}, {transform_indices = @transform_4, window_bounds = array<i64: 1, 128>}, {transform_indices = @transform_5, window_bounds = array<i64: 16, 128>}, {transform_indices = @transform_6, window_bounds = array<i64: 16, 128>}]} {
    %c0_i32 = arith.constant 0 : i32
    %0 = arith.cmpi eq, %arg2, %c0_i32 : i32
    %1 = arith.extui %0 : i1 to i32
    %c0_i32_0 = arith.constant 0 : i32
    %2 = arith.cmpi ne, %1, %c0_i32_0 : i32
    scf.if %2 {
      %cst_10 = arith.constant 0.000000e+00 : f32
      %12 = vector.broadcast %cst_10 : f32 to vector<16x128xf32>
      %c0_11 = arith.constant 0 : index
      %c0_12 = arith.constant 0 : index
      %13 = vector.load %arg8[%c0_11, %c0_12] : memref<16x128xf32, #tpu.memory_space<vmem>>, vector<16x128xf32>
      tpu.vector_store %arg8[%c0_11, %c0_12], %12 {strides = array<i32>} : memref<16x128xf32, #tpu.memory_space<vmem>>, vector<16x128xf32>,
    } else {
    }
    %c0 = arith.constant 0 : index
    %c0_1 = arith.constant 0 : index
    %3 = vector.load %arg8[%c0, %c0_1] : memref<16x128xf32, #tpu.memory_space<vmem>>, vector<16x128xf32>
    %c0_2 = arith.constant 0 : index
    %c0_3 = arith.constant 0 : index
    %4 = vector.load %arg3[%c0_2, %c0_3] : memref<16x128xbf16, #tpu.memory_space<vmem>>, vector<16x128xbf16>
    %c0_4 = arith.constant 0 : index
    %c0_5 = arith.constant 0 : index
    %5 = vector.load %arg4[%c0_4, %c0_5] : memref<128x128xbf16, #tpu.memory_space<vmem>>, vector<128x128xbf16>
    %cst = arith.constant dense<0.000000e+00> : vector<16x128xf32>
    %6 = tpu.matmul %4, %5, %cst {dimension_numbers = #tpu.dot_dimension_numbers<[1], [0], [0], [1], [0, 0, 1, 1], [], []>} : vector<16x128xbf16>, vector<128x128xbf16>, vector<16x128xf32> -> vector<16x128xf32>
    %7 = arith.addf %3, %6 : vector<16x128xf32>
    %c0_6 = arith.constant 0 : index
    %c0_7 = arith.constant 0 : index
    %8 = vector.load %arg8[%c0_6, %c0_7] : memref<16x128xf32, #tpu.memory_space<vmem>>, vector<16x128xf32>
    tpu.vector_store %arg8[%c0_6, %c0_7], %7 {strides = array<i32>} : memref<16x128xf32, #tpu.memory_space<vmem>>, vector<16x128xf32>,
    %c0_i32_8 = arith.constant 0 : i32
    %9 = arith.cmpi eq, %arg2, %c0_i32_8 : i32
    %10 = arith.extui %9 : i1 to i32
    %c0_i32_9 = arith.constant 0 : i32
    %11 = arith.cmpi ne, %10, %c0_i32_9 : i32
    scf.if %11 {
      %c0_10 = arith.constant 0 : index
      %c0_11 = arith.constant 0 : index
      %12 = vector.load %arg8[%c0_10, %c0_11] : memref<16x128xf32, #tpu.memory_space<vmem>>, vector<16x128xf32>
      %c0_12 = arith.constant 0 : index
      %c0_13 = arith.constant 0 : index
      %13 = vector.load %arg5[%c0_12, %c0_13] : memref<1x128xf32, #tpu.memory_space<vmem>>, vector<1x128xf32>
      %14 = vector.broadcast %13 : vector<1x128xf32> to vector<16x128xf32>
      %15 = arith.addf %12, %14 : vector<16x128xf32>
      %c0_14 = arith.constant 0 : index
      %c0_15 = arith.constant 0 : index
      %16 = vector.load %arg8[%c0_14, %c0_15] : memref<16x128xf32, #tpu.memory_space<vmem>>, vector<16x128xf32>
      tpu.vector_store %arg8[%c0_14, %c0_15], %15 {strides = array<i32>} : memref<16x128xf32, #tpu.memory_space<vmem>>, vector<16x128xf32>,
      %c0_16 = arith.constant 0 : index
      %c0_17 = arith.constant 0 : index
      %17 = vector.load %arg7[%c0_16, %c0_17] : memref<1x128xi32, #tpu.memory_space<vmem>>, vector<1x128xi32>
      %c0_18 = arith.constant 0 : index
      %c0_19 = arith.constant 0 : index
      %18 = vector.load %arg6[%c0_18, %c0_19] : memref<16x1xi32, #tpu.memory_space<vmem>>, vector<16x1xi32>
      %19 = vector.broadcast %17 : vector<1x128xi32> to vector<16x128xi32>
      %20 = vector.broadcast %18 : vector<16x1xi32> to vector<16x128xi32>
      %21 = arith.cmpi eq, %19, %20 : vector<16x128xi32>
      %cst_20 = arith.constant 0.000000e+00 : f32
      %22 = vector.broadcast %cst_20 : f32 to vector<16x128xf32>
      %23 = arith.select %21, %22, %15 : vector<16x128xi1>, vector<16x128xf32>
      %24 = arith.mulf %23, %23 : vector<16x128xf32>
      %cst_21 = arith.constant dense<0.000000e+00> : vector<16xf32>
      %25 = vector.multi_reduction <add>, %24, %cst_21 [1] : vector<16x128xf32> to vector<16xf32>
      %26 = vector.shape_cast %25 : vector<16xf32> to vector<16x1xf32>
      %27 = vector.shape_cast %26 : vector<16x1xf32> to vector<16x1xf32>
      %28 = vector.broadcast %27 : vector<16x1xf32> to vector<16x128xf32>
      %c0_22 = arith.constant 0 : index
      %c0_23 = arith.constant 0 : index
      %29 = vector.load %arg9[%c0_22, %c0_23] : memref<16x128xf32, #tpu.memory_space<vmem>>, vector<16x128xf32>
      tpu.vector_store %arg9[%c0_22, %c0_23], %28 {strides = array<i32>} : memref<16x128xf32, #tpu.memory_space<vmem>>, vector<16x128xf32>,
    } else {
    }
    return
  }
  func.func @transform_0(%arg0: i32, %arg1: i32, %arg2: i32) -> (i32, i32) {
    %c0_i32 = arith.constant 0 : i32
    return %arg0, %arg2 : i32, i32
  }
  func.func @transform_1(%arg0: i32, %arg1: i32, %arg2: i32) -> (i32, i32) {
    %c0_i32 = arith.constant 0 : i32
    return %arg2, %arg1 : i32, i32
  }
  func.func @transform_2(%arg0: i32, %arg1: i32, %arg2: i32) -> (i32, i32) {
    %c0_i32 = arith.constant 0 : i32
    %c0_i32_0 = arith.constant 0 : i32
    return %c0_i32, %arg1 : i32, i32
  }
  func.func @transform_3(%arg0: i32, %arg1: i32, %arg2: i32) -> (i32, i32) {
    %c0_i32 = arith.constant 0 : i32
    %c0_i32_0 = arith.constant 0 : i32
    return %arg0, %c0_i32 : i32, i32
  }
  func.func @transform_4(%arg0: i32, %arg1: i32, %arg2: i32) -> (i32, i32) {
    %c0_i32 = arith.constant 0 : i32
    %c0_i32_0 = arith.constant 0 : i32
    return %c0_i32, %arg1 : i32, i32
  }
  func.func @transform_5(%arg0: i32, %arg1: i32, %arg2: i32) -> (i32, i32) {
    %c0_i32 = arith.constant 0 : i32
    return %arg0, %arg1 : i32, i32
  }
  func.func @transform_6(%arg0: i32, %arg1: i32, %arg2: i32) -> (i32, i32) {
    %c0_i32 = arith.constant 0 : i32
    return %arg0, %arg1 : i32, i32
  }
}

</mosaic_0001>

<bundles_post_ra>
// kernel: tpu_custom_call.1
= control target key start
LH: loop header
LB: loop body
LE: loop exit
PB: predicated region body
PF: predicated region fallthrough
CT: control target
= control target key end

     0   :  { %12 = vsyncpa [#allocation3], 0  ;;  %s433_s0 = inlined_call_operand.vmem [shape: bf16[16,128], index: 0, kind: input, shape index: {}]   ;;  %s434_s1 = inlined_call_operand.hbm [shape: bf16[128,128], index: 1, kind: input, shape index: {}]   ;;  %s435_s2 = inlined_call_operand.vmem [shape: f32[1,128], index: 2, kind: input, shape index: {}]   ;;  %s436_s3 = inlined_call_operand.vmem [shape: s32[16,1], index: 3, kind: input, shape index: {}]   ;;  %s437_s4 = inlined_call_operand.vmem [shape: s32[1,128], index: 4, kind: input, shape index: {}]   ;;  %s438_s5 = inlined_call_operand.hbm [shape: f32[16,128], index: 5, kind: output, shape index: {0}]   ;;  %s439_s6 = inlined_call_operand.hbm [shape: f32[16,128], index: 6, kind: output, shape index: {1}]  }
   0x1   :  { %13 = vsyncpa [#allocation4], 0 }
   0x2   :  { %14 = vsyncpa [#allocation7], 0  ;;  %s364_s21 = smov [#allocation2]  }
   0x3   :  { %s22_s22 = sshll.u32 %s364_s21, 4  ;;  %s23_s22 = int_to_ptr.vmem [resolvable:$true] %s22_s22 }
   0x4   :  { %s306_s23 = scalar_lea.vmem %s23_s22, 1024  ;;  %p311_p1 = scmp.lt.s32.totalorder %s23_s22, %s23_s22 }
   0x5   :  { %p307_p0 = scmp.ne.s32.totalorder %s23_s22, %s306_s23  ;;  %p312_p2 = scmp.lt.s32.totalorder %s306_s23, %s306_s23 }
   0x7   :  { %p313_p3 = por %p312_p2, %p311_p1 }
   0x9   :  { %p314_p4 = pnand %p313_p3, %p307_p0 }
   0xb   :  { %317 = shalt.err (!%p314_p4)
}
   0xc   :  { %s365_s24 = smov 64   ;;  %s366_s25 = smov 4  }
   0xd   :  { %28 = dma.hbm_to_vmem [thread:$0]  %s434_s1, 1024, %s23_s22, [#allocation3], %s365_s24, %s365_s24, %s366_s25  }
   0xe   :  { %358 = dma.done.wait [#allocation3], 1024  }
   0xf   :  { %359 = vsyncadd [#allocation3], 4294966272  ;;  %v367_v0 = vmov 0.0   ;;  %vm368_vm0 = vmmov 0   ;;  %v369_v1 = vmov 0   ;;  %v289_v2 = vld [vmem:[#allocation2 + $0x38] sm:$0xff]  }
  0x10   :  { %258 = vmatprep.subr.bf16.mxu0 %v367_v0  ;;  %274 = vmatprep.mubr.msk.bf16.mxu0 %vm368_vm0, %v367_v0  ;;  %v290_v3 = vld [vmem:[#allocation2 + $0x30] sm:$0xff]   ;;  %v291_v4 = vld [vmem:[#allocation2 + $0x28] sm:$0xff]   ;;  %v181_v5 = vld [vmem:[%s436_s3] sm:$0xff] }
  0x11   :  { %288 = vset.pattern.permute.xlu0 %v369_v1  ;;  %259 = vmatpush3.bf16.msra.mxu0 %v289_v2  ;;  %v292_v6 = vld [vmem:[#allocation2 + $0x20] sm:$0xff]   ;;  %v182_v7 = vld [vmem:[%s436_s3 + $0x8] sm:$0xff]  ;;  %v293_v8 = vld [vmem:[#allocation2 + $0x18] sm:$0xff]  }
  0x12   :  { %260 = vmatprep.subr.bf16.mxu0 %v367_v0  ;;  %188 = vperm.xlu0 %288, %v181_v5   ;;  %v294_v9 = vld [vmem:[#allocation2 + $0x10] sm:$0xff]   ;;  %v295_v10 = vld [vmem:[#allocation2 + $0x8] sm:$0xff]   ;;  %v296_v11 = vld [vmem:[#allocation2] sm:$0xff]  }
  0x13   :  { %v297_v12 = vld [vmem:[%s433_s0] sm:$0xff]   ;;  %s370_s0 = smov [#allocation5]  }
  0x14   :  { %v248_v14 = vld [vmem:[%s437_s4] ss:$0 sm:$0xff]  ;;  %s210_s4 = sshll.u32 %s370_s0, 4  ;;  %s211_s4 = int_to_ptr.vmem [resolvable:$true] %s210_s4 }
  0x15   :  { %261 = vmatpush3.bf16.msra.mxu0 %v290_v3  ;;  %v247_v16 = vld [vmem:[%s435_s2] ss:$0 sm:$0xff]  ;;  %s318_s2 = scalar_lea.vmem %s211_s4, 256  ;;  %p323_p6 = scmp.lt.s32.totalorder %s211_s4, %s211_s4 }
  0x16   :  { %262 = vmatprep.subr.bf16.mxu0 %v367_v0  ;;  %191 = vperm.xlu0 %288, %v182_v7   ;;  %p319_p5 = scmp.ne.s32.totalorder %s211_s4, %s318_s2  ;;  %p324_p7 = scmp.lt.s32.totalorder %s318_s2, %s318_s2 }
  0x18   :  { %p325_p8 = por %p324_p7, %p323_p6 }
  0x19   :  { %263 = vmatpush3.bf16.msra.mxu0 %v291_v4 }
  0x1a   :  { %264 = vmatprep.subr.bf16.mxu0 %v367_v0  ;;  %p326_p9 = pnand %p325_p8, %p319_p5 }
  0x1d   :  { %265 = vmatpush3.bf16.msra.mxu0 %v292_v6 }
  0x1e   :  { %266 = vmatprep.subr.bf16.mxu0 %v367_v0 }
  0x21   :  { %267 = vmatpush3.bf16.msra.mxu0 %v293_v8 }
  0x22   :  { %268 = vmatprep.subr.bf16.mxu0 %v367_v0 }
  0x25   :  { %269 = vmatpush3.bf16.msra.mxu0 %v294_v9 }
  0x26   :  { %270 = vmatprep.subr.bf16.mxu0 %v367_v0 }
  0x29   :  { %271 = vmatpush3.bf16.msra.mxu0 %v295_v10 }
  0x2a   :  { %272 = vmatprep.subr.bf16.mxu0 %v367_v0 }
  0x2d   :  { %273 = vmatpush3.bf16.msra.mxu0 %v296_v11 }
  0x30   :  { %275 = vmatmul.mubr.bf16.vlgmr.msra.gmra.mxu0 %v297_v12 }
  0x8d   :  { %v189_v13 = vpop.permute.xlu0 %188 }
  0x8e   :  { %vm193_vm1 = vcmp.eq.s32.totalorder %v248_v14, %v189_v13 }
  0x91   :  { %v192_v20 = vpop.permute.xlu0 %191 }
  0x92   :  { %vm194_vm2 = vcmp.eq.s32.totalorder %v248_v14, %v192_v20 }
  0xf0   :  { %v153_v15 = vpop.f32.mrf.mxu0 }
  0xf1   :  { %v176_v18 = vadd.f32 %v247_v16, %v153_v15 }
  0xf2   :  { %v276_v17 = vpop.f32.mrf.mxu0 }
  0xf3   :  { %v195_v21 = vsel %vm193_vm1, 0.0, %v176_v18  ;;  %178 = vst [vmem:[#allocation5] sm:$0xff] %v176_v18 }
  0xf4   :  { %v156_v19 = vpop.f32.mrf.mxu0  ;;  %v197_v23 = vmul.f32 %v195_v21, %v195_v21 }
  0xf5   :  { %v177_v24 = vadd.f32 %v247_v16, %v156_v19 }
  0xf6   :  { %v277_v22 = vpop.f32.mrf.mxu0  ;;  %199 = vadd.xlane.f32.xlu1 %v197_v23 }
  0xf7   :  { %v196_v25 = vsel %vm194_vm2, 0.0, %v177_v24  ;;  %179 = vst [vmem:[#allocation5 + $0x8] sm:$0xff] %v177_v24 }
  0xf8   :  { %v198_v26 = vmul.f32 %v196_v25, %v196_v25 }
  0xfa   :  { %201 = vadd.xlane.f32.xlu1 %v198_v26 }
  0xfb   :  { %329 = shalt.err (!%p326_p9)
}
  0xfc   :  { %s371_s12 = smov 128   ;;  %s372_s13 = smov 8  }
  0xfd   :  { %216 = dma.vmem_to_hbm [thread:$0]  %s211_s4, 256, %s438_s5, [#allocation4], %s371_s12, %s371_s12, %s372_s13  }
  0xfe   :  { %s373_s16 = smov [#allocation6]  }
  0xff   :  { %s222_s17 = sshll.u32 %s373_s16, 4  ;;  %s223_s17 = int_to_ptr.vmem [resolvable:$true] %s222_s17 }
 0x100   :  { %s338_s18 = scalar_lea.vmem %s223_s17, 256  ;;  %p343_p11 = scmp.lt.s32.totalorder %s223_s17, %s223_s17 }
 0x101   :  { %p339_p10 = scmp.ne.s32.totalorder %s223_s17, %s338_s18  ;;  %p344_p12 = scmp.lt.s32.totalorder %s338_s18, %s338_s18 }
 0x103   :  { %p345_p13 = por %p344_p12, %p343_p11 }
 0x105   :  { %p346_p0 = pnand %p345_p13, %p339_p10 }
 0x17f   :  { %v200_v27 = vpop.xlane.xlu1 %199 }
 0x180   :  { %203 = vst [vmem:[#allocation6] sm:$0xff] %v200_v27 }
 0x183   :  { %v202_v28 = vpop.xlane.xlu1 %201 }
 0x184   :  { %204 = vst [vmem:[#allocation6 + $0x8] sm:$0xff] %v202_v28 }
 0x185   :  { %349 = shalt.err (!%p346_p0)
}
 0x186   :  { %228 = dma.vmem_to_hbm [thread:$0]  %s223_s17, 256, %s439_s6, [#allocation7], %s371_s12, %s371_s12, %s372_s13  }
 0x187   :  { %360 = dma.done.wait [#allocation4], 256  }
 0x188   :  { %361 = vsyncadd [#allocation4], 4294967040 }
 0x189   :  { %362 = dma.done.wait [#allocation7], 256  }
 0x18a   :  { %363 = vsyncadd [#allocation7], 4294967040 }
 0x18b   :  { %235 = vsyncpa [#allocation3], 1 }
 0x18c   :  { %236 = vsyncpa [#allocation4], 1 }
 0x18d   :  { %237 = vsyncpa [#allocation7], 1 }

</bundles_post_ra>
